<compile_context>
chip_gen: v7x
topology: tpu7x:2x2x1
jax: 0.10.0
libtpu: 0.0.40
codegen_flags: <defaults>
</compile_context>

<pallas_src>
import functools

import jax
import jax.numpy as jnp
import numpy as np
from jax.experimental import pallas as pl
from jax.experimental.pallas import tpu as pltpu

BN_EPS = 1e-3

# bf16 operands run the MXU at its native rate on v5e/v6e/v7x; accumulation is
# f32 via preferred_element_type.  Verification tolerance relaxed to ~2e-2.
MXU_DTYPE = jnp.bfloat16
# Sublane tile of MXU_DTYPE: padded-scratch interiors start on this column so
# the per-step interior stores are unmasked full-tile stores.
_SUB = 16 if MXU_DTYPE == jnp.bfloat16 else 8

# Fits under v7x's 64 MiB physical VMEM with headroom; well under v5e/v6e's
# 128 MiB.  TODO(synk): make this (and the row-band size) per-generation.
VMEM_LIMIT_BYTES = 48 * 1024 * 1024


# ----------------------------------------------------------------------------
# Kernel 1: BatchNorm batch statistics (tiled reduction over the batch grid).
# ----------------------------------------------------------------------------
def bn_stats_kernel(x_ref, mean_ref, inv_ref, sum_ref, sq_ref, *, eps, n_batch):
    b = pl.program_id(0)
    _, H, W, cin = x_ref.shape

    @pl.when(b == 0)
    def _init():
        sum_ref[...] = jnp.zeros_like(sum_ref)
        sq_ref[...] = jnp.zeros_like(sq_ref)

    # Per-step reduction over H is a run of plain VPU adds over the leading
    # (untiled) axis — no per-step cross-sublane / XLU work, so it stays
    # hidden under the HBM input DMA even on v5e.  The narrow (W, Cin) ->
    # (1, Cin) fold happens once, at finalize.
    x = x_ref[0]                                       # (H, W, Cin) f32
    sum_ref[...] += jnp.sum(x, axis=0)                 # (W, Cin) partials
    sq_ref[...] += jnp.sum(x * x, axis=0)

    @pl.when(b == n_batch - 1)
    def _finalize():
        cnt = float(n_batch * H * W)
        mean = jnp.sum(sum_ref[...], axis=0, keepdims=True) / cnt
        msq = jnp.sum(sq_ref[...], axis=0, keepdims=True) / cnt
        var = msq - mean * mean                        # biased (training) var
        mean_ref[...] = mean
        inv_ref[...] = jax.lax.rsqrt(var + eps)


def run_bn_stats(x):
    N, H, W, cin = x.shape
    kernel = functools.partial(bn_stats_kernel, eps=BN_EPS, n_batch=N)
    mean, inv = pl.pallas_call(
        kernel,
        out_shape=(jax.ShapeDtypeStruct((1, cin), jnp.float32),
                   jax.ShapeDtypeStruct((1, cin), jnp.float32)),
        grid=(N,),
        in_specs=[pl.BlockSpec((1, H, W, cin), lambda b: (b, 0, 0, 0))],
        out_specs=(pl.BlockSpec((1, cin), lambda b: (0, 0)),
                   pl.BlockSpec((1, cin), lambda b: (0, 0))),
        scratch_shapes=[pltpu.VMEM((W, cin), jnp.float32),
                        pltpu.VMEM((W, cin), jnp.float32)],
        compiler_params=pltpu.CompilerParams(
            # Sequential accumulation across the batch axis -> must stay
            # "arbitrary" (per-core partial sums would be needed to split it).
            dimension_semantics=("arbitrary",),
            vmem_limit_bytes=VMEM_LIMIT_BYTES),
    )(x)
    return mean, inv


# ----------------------------------------------------------------------------
# Kernel 2: BN-normalize -> conv3x3 -> SiLU -> conv3x3 -> +residual
#           [+ fused AvgPool2d(2) on the last block].  Batch-parallel.
# ----------------------------------------------------------------------------
def resblock_conv_kernel(x_ref, mean_ref, inv_ref, w1_ref, b1_ref, w2_ref,
                         b2_ref, *rest, has_proj, fuse_pool, mxu_dtype):
    rest = list(rest)
    if has_proj:
        ws_ref = rest.pop(0)
        bs_ref = rest.pop(0)
    o_skip_ref = rest.pop(0)
    o_pool_ref = rest.pop(0) if fuse_pool else None
    xpad_ref, hpad_ref = rest

    _, H, W, cin = x_ref.shape
    cout = b1_ref.shape[-1]
    HW = H * W
    pad = _SUB                      # aligned interior column offset

    # Zero only the halo borders the 3x3 taps actually read.  Done every step
    # (cheap), so there is no cross-step scratch dependence and the batch axis
    # can safely run megacore-"parallel" on v7x.
    def zero_borders(ref, c):
        wp = ref.shape[1]
        ref[0:1, :, :] = jnp.zeros((1, wp, c), mxu_dtype)
        ref[H + 1:H + 2, :, :] = jnp.zeros((1, wp, c), mxu_dtype)
        ref[:, 0:pad, :] = jnp.zeros((H + 2, pad, c), mxu_dtype)
        ref[:, pad + W:wp, :] = jnp.zeros((H + 2, wp - pad - W, c), mxu_dtype)

    zero_borders(xpad_ref, cin)
    zero_borders(hpad_ref, cout)

    # --- BN normalize (f32 math) -> bf16 padded scratch ---------------------
    x = x_ref[0]                                              # (H, W, Cin) f32
    xn = ((x - mean_ref[...].reshape(1, 1, cin))
          * inv_ref[...].reshape(1, 1, cin))
    xpad_ref[1:H + 1, pad:pad + W, :] = xn.astype(mxu_dtype)  # aligned store

    # --- conv1: nine accumulating per-tap MXU dots (no 9x im2col slab) ------
    acc = jnp.broadcast_to(b1_ref[...], (HW, cout)).astype(jnp.float32)
    for ky in range(3):
        for kx in range(3):
            c0 = pad - 1 + kx
            tap = xpad_ref[ky:ky + H, c0:c0 + W, :].reshape(HW, cin)
            acc = acc + jnp.dot(tap, w1_ref[3 * ky + kx],
                                preferred_element_type=jnp.float32)
    h = acc * jax.nn.sigmoid(acc)                             # SiLU (f32)
    hpad_ref[1:H + 1, pad:pad + W, :] = (
        h.reshape(H, W, cout).astype(mxu_dtype))

    # --- conv2: nine accumulating per-tap MXU dots ---------------------------
    acc2 = jnp.broadcast_to(b2_ref[...], (HW, cout)).astype(jnp.float32)
    for ky in range(3):
        for kx in range(3):
            c0 = pad - 1 + kx
            tap = hpad_ref[ky:ky + H, c0:c0 + W, :].reshape(HW, cout)
            acc2 = acc2 + jnp.dot(tap, w2_ref[3 * ky + kx],
                                  preferred_element_type=jnp.float32)

    # --- residual path uses the ORIGINAL (pre-BN) x --------------------------
    if has_proj:
        res = jnp.dot(x.reshape(HW, cin).astype(mxu_dtype), ws_ref[...],
                      preferred_element_type=jnp.float32) + bs_ref[...]
    else:
        res = x.reshape(HW, cout)
    y = acc2 + res                                            # (HW, Cout) f32

    # --- lane-dense skip store: (H, W*Cout) slab -----------------------------
    yh = y.reshape(H, W * cout)
    o_skip_ref[0] = yh

    if fuse_pool:
        # AvgPool2d(2) fused into the output path (no extra HBM round trip).
        Ho, Wo = H // 2, W // 2
        v = yh.reshape(Ho, 2, W * cout)
        rows = v[:, 0, :] + v[:, 1, :]                        # (Ho, W*Cout)
        rc = rows.reshape(Ho, Wo, 2 * cout)
        pooled = 0.25 * (rc[:, :, :cout] + rc[:, :, cout:])
        o_pool_ref[0] = pooled.reshape(Ho, Wo * cout)


def run_resblock_conv(x, mean, inv, p, *, fuse_pool):
    N, H, W, cin = x.shape
    cout = p["b1"].shape[-1]
    has_proj = p["ws"] is not None
    Ho, Wo = H // 2, W // 2
    wp = 2 * _SUB + W                 # padded-scratch width (aligned interior)

    kernel = functools.partial(
        resblock_conv_kernel, has_proj=has_proj, fuse_pool=fuse_pool,
        mxu_dtype=MXU_DTYPE)

    in_specs = [
        pl.BlockSpec((1, H, W, cin), lambda b: (b, 0, 0, 0)),
        pl.BlockSpec((1, cin), lambda b: (0, 0)),
        pl.BlockSpec((1, cin), lambda b: (0, 0)),
        pl.BlockSpec((9, cin, cout), lambda b: (0, 0, 0)),
        pl.BlockSpec((1, cout), lambda b: (0, 0)),
        pl.BlockSpec((9, cout, cout), lambda b: (0, 0, 0)),
        pl.BlockSpec((1, cout), lambda b: (0, 0)),
    ]
    args = [x, mean, inv, p["w1t"], p["b1"], p["w2t"], p["b2"]]
    if has_proj:
        in_specs += [pl.BlockSpec((cin, cout), lambda b: (0, 0)),
                     pl.BlockSpec((1, cout), lambda b: (0, 0))]
        args += [p["wst"], p["bs"]]

    out_shape = [jax.ShapeDtypeStruct((N, H, W * cout), jnp.float32)]
    out_specs = [pl.BlockSpec((1, H, W * cout), lambda b: (b, 0, 0))]
    if fuse_pool:
        out_shape.append(jax.ShapeDtypeStruct((N, Ho, Wo * cout), jnp.float32))
        out_specs.append(pl.BlockSpec((1, Ho, Wo * cout), lambda b: (b, 0, 0)))

    scratch_shapes = [
        pltpu.VMEM((H + 2, wp, cin), MXU_DTYPE),    # padded BN(x), bf16
        pltpu.VMEM((H + 2, wp, cout), MXU_DTYPE),   # padded SiLU(conv1), bf16
    ]

    outs = pl.pallas_call(
        kernel,
        out_shape=tuple(out_shape),
        grid=(N,),
        in_specs=in_specs,
        out_specs=tuple(out_specs),
        scratch_shapes=scratch_shapes,
        compiler_params=pltpu.CompilerParams(
            # Batch-parallel: v7x splits the conv work across both TCs; no-op
            # on single-TC v5e/v6e.
            dimension_semantics=("parallel",),
            vmem_limit_bytes=VMEM_LIMIT_BYTES),
    )(*args)

    skip = outs[0].reshape(N, H, W, cout)
    pooled = outs[1].reshape(N, Ho, Wo, cout) if fuse_pool else None
    return skip, pooled


# ----------------------------------------------------------------------------
# DownBlock forward (wrapper glue) + deterministic parameter init.
# ----------------------------------------------------------------------------
def conv_init(key, kh, kw, cin, cout):
    """PyTorch-style uniform(-1/sqrt(fan_in), 1/sqrt(fan_in)); HWIO layout."""
    k1, k2 = jax.random.split(key)
    bound = 1.0 / float(np.sqrt(cin * kh * kw))
    w = jax.random.uniform(k1, (kh, kw, cin, cout), jnp.float32, -bound, bound)
    b = jax.random.uniform(k2, (1, cout), jnp.float32, -bound, bound)
    return w, b


def make_resblock_params(key, cin, cout):
    k1, k2, k3 = jax.random.split(key, 3)
    w1, b1 = conv_init(k1, 3, 3, cin, cout)
    w2, b2 = conv_init(k2, 3, 3, cout, cout)
    if cin != cout:
        ws, bs = conv_init(k3, 1, 1, cin, cout)
        ws = ws.reshape(cin, cout)
    else:
        ws, bs = None, None
    return dict(
        w1=w1, b1=b1, w2=w2, b2=b2, ws=ws, bs=bs,
        # Per-tap weight stacks, pre-cast ONCE to the MXU dtype (the kernel
        # runs 9 accumulating dots instead of building a 9x im2col slab):
        w1t=w1.reshape(9, cin, cout).astype(MXU_DTYPE),
        w2t=w2.reshape(9, cout, cout).astype(MXU_DTYPE),
        wst=None if ws is None else ws.astype(MXU_DTYPE))


def downblock_forward(x_nchw, params):
    x = jnp.transpose(x_nchw, (0, 2, 3, 1))               # NCHW -> NHWC
    skips = []
    pooled = None
    for i, p in enumerate(params):
        last = i == len(params) - 1
        mean, inv = run_bn_stats(x)
        x, pooled = run_resblock_conv(x, mean, inv, p, fuse_pool=last)
        skips.append(jnp.transpose(x, (0, 3, 1, 2)))      # NHWC -> NCHW
    return jnp.transpose(pooled, (0, 3, 1, 2)), skips


# ----------------------------------------------------------------------------
# Pure-JAX reference (for verification).
# ----------------------------------------------------------------------------
def _conv_same(x, w, b):
    return jax.lax.conv_general_dilated(
        x, w, (1, 1), "SAME",
        dimension_numbers=("NHWC", "HWIO", "NHWC")) + b


def ref_resblock(x, p, eps=BN_EPS):
    if p["ws"] is not None:
        res = _conv_same(x, p["ws"][None, None], p["bs"])
    else:
        res = x
    m = jnp.mean(x, axis=(0, 1, 2), keepdims=True)
    v = jnp.mean((x - m) ** 2, axis=(0, 1, 2), keepdims=True)
    xn = (x - m) * jax.lax.rsqrt(v + eps)
    h = _conv_same(xn, p["w1"], p["b1"])
    h = h * jax.nn.sigmoid(h)
    out = _conv_same(h, p["w2"], p["b2"])
    return out + res


def downblock_ref(x_nchw, params):
    x = jnp.transpose(x_nchw, (0, 2, 3, 1))
    skips = []
    for p in params:
        x = ref_resblock(x, p)
        skips.append(jnp.transpose(x, (0, 3, 1, 2)))
    N, H, W, C = x.shape
    x = x.reshape(N, H // 2, 2, W // 2, 2, C).mean(axis=(2, 4))
    return jnp.transpose(x, (0, 3, 1, 2)), skips


if __name__ == "__main__":
    key = jax.random.PRNGKey(0)
    kx, k0, k1 = jax.random.split(key, 3)

    N, C_IN, C_OUT, H, W = 2, 4, 8, 16, 16
    x_nchw = jax.random.normal(kx, (N, C_IN, H, W), jnp.float32)

    params = [make_resblock_params(k0, C_IN, C_OUT),
              make_resblock_params(k1, C_OUT, C_OUT)]

    out, skips = downblock_forward(x_nchw, params)
    out = jax.block_until_ready(out)

    ref_out, ref_skips = downblock_ref(x_nchw, params)
    assert out.shape == (N, C_OUT, H // 2, W // 2), out.shape
    # bf16 MXU operands -> ~2e-2 tolerance (BN / SiLU / accumulation are f32).
    np.testing.assert_allclose(np.asarray(out), np.asarray(ref_out),
                               rtol=2e-2, atol=2e-2)
    for s, rs in zip(skips, ref_skips):
        np.testing.assert_allclose(np.asarray(s), np.asarray(rs),
                                   rtol=2e-2, atol=2e-2)

    print("KERNEL_OK")
</pallas_src>

<mosaic_0001>
module attributes {stable_mosaic.version = 11 : i64} {
  func.func @bn_stats_kernel(%arg0: i32, %arg1: memref<1x16x16x4xf32, #tpu.memory_space<vmem>>, %arg2: memref<1x4xf32, #tpu.memory_space<vmem>>, %arg3: memref<1x4xf32, #tpu.memory_space<vmem>>, %arg4: memref<16x4xf32, #tpu.memory_space<vmem>>, %arg5: memref<16x4xf32, #tpu.memory_space<vmem>>) attributes {dimension_semantics = [#tpu.dimension_semantics<arbitrary>], iteration_bounds = array<i64: 2>, scalar_prefetch = 0 : i64, scratch_operands = 2 : i64, tpu.core_type = #tpu.core_type<tc>, window_params = [{transform_indices = @transform_0, window_bounds = array<i64: 1, 16, 16, 4>}, {pipeline_mode = #tpu.pipeline_mode<synchronous>, transform_indices = @transform_1, window_bounds = array<i64: 1, 4>}, {pipeline_mode = #tpu.pipeline_mode<synchronous>, transform_indices = @transform_2, window_bounds = array<i64: 1, 4>}]} {
    %c0_i32 = arith.constant 0 : i32
    %0 = arith.cmpi eq, %arg0, %c0_i32 : i32
    %1 = arith.extui %0 : i1 to i32
    %c0_i32_0 = arith.constant 0 : i32
    %2 = arith.cmpi ne, %1, %c0_i32_0 : i32
    scf.if %2 {
      %cst_14 = arith.constant 0.000000e+00 : f32
      %17 = vector.broadcast %cst_14 : f32 to vector<16x4xf32>
      %c0_15 = arith.constant 0 : index
      %c0_16 = arith.constant 0 : index
      %18 = vector.load %arg4[%c0_15, %c0_16] : memref<16x4xf32, #tpu.memory_space<vmem>>, vector<16x4xf32>
      tpu.vector_store %arg4[%c0_15, %c0_16], %17 {strides = array<i32>} : memref<16x4xf32, #tpu.memory_space<vmem>>, vector<16x4xf32>,
      %cst_17 = arith.constant 0.000000e+00 : f32
      %19 = vector.broadcast %cst_17 : f32 to vector<16x4xf32>
      %c0_18 = arith.constant 0 : index
      %c0_19 = arith.constant 0 : index
      %20 = vector.load %arg5[%c0_18, %c0_19] : memref<16x4xf32, #tpu.memory_space<vmem>>, vector<16x4xf32>
      tpu.vector_store %arg5[%c0_18, %c0_19], %19 {strides = array<i32>} : memref<16x4xf32, #tpu.memory_space<vmem>>, vector<16x4xf32>,
    } else {
    }
    %c0 = arith.constant 0 : index
    %c0_1 = arith.constant 0 : index
    %c0_2 = arith.constant 0 : index
    %c0_3 = arith.constant 0 : index
    %3 = vector.load %arg1[%c0, %c0_1, %c0_2, %c0_3] : memref<1x16x16x4xf32, #tpu.memory_space<vmem>>, vector<1x16x16x4xf32>
    %4 = vector.shape_cast %3 : vector<1x16x16x4xf32> to vector<16x16x4xf32>
    %c0_4 = arith.constant 0 : index
    %c0_5 = arith.constant 0 : index
    %5 = vector.load %arg4[%c0_4, %c0_5] : memref<16x4xf32, #tpu.memory_space<vmem>>, vector<16x4xf32>
    %cst = arith.constant dense<0.000000e+00> : vector<16x4xf32>
    %6 = vector.multi_reduction <add>, %4, %cst [0] : vector<16x16x4xf32> to vector<16x4xf32>
    %7 = arith.addf %5, %6 : vector<16x4xf32>
    %c0_6 = arith.constant 0 : index
    %c0_7 = arith.constant 0 : index
    %8 = vector.load %arg4[%c0_6, %c0_7] : memref<16x4xf32, #tpu.memory_space<vmem>>, vector<16x4xf32>
    tpu.vector_store %arg4[%c0_6, %c0_7], %7 {strides = array<i32>} : memref<16x4xf32, #tpu.memory_space<vmem>>, vector<16x4xf32>,
    %c0_8 = arith.constant 0 : index
    %c0_9 = arith.constant 0 : index
    %9 = vector.load %arg5[%c0_8, %c0_9] : memref<16x4xf32, #tpu.memory_space<vmem>>, vector<16x4xf32>
    %10 = arith.mulf %4, %4 : vector<16x16x4xf32>
    %cst_10 = arith.constant dense<0.000000e+00> : vector<16x4xf32>
    %11 = vector.multi_reduction <add>, %10, %cst_10 [0] : vector<16x16x4xf32> to vector<16x4xf32>
    %12 = arith.addf %9, %11 : vector<16x4xf32>
    %c0_11 = arith.constant 0 : index
    %c0_12 = arith.constant 0 : index
    %13 = vector.load %arg5[%c0_11, %c0_12] : memref<16x4xf32, #tpu.memory_space<vmem>>, vector<16x4xf32>
    tpu.vector_store %arg5[%c0_11, %c0_12], %12 {strides = array<i32>} : memref<16x4xf32, #tpu.memory_space<vmem>>, vector<16x4xf32>,
    %c1_i32 = arith.constant 1 : i32
    %14 = arith.cmpi eq, %arg0, %c1_i32 : i32
    %15 = arith.extui %14 : i1 to i32
    %c0_i32_13 = arith.constant 0 : i32
    %16 = arith.cmpi ne, %15, %c0_i32_13 : i32
    scf.if %16 {
      %c0_14 = arith.constant 0 : index
      %c0_15 = arith.constant 0 : index
      %17 = vector.load %arg4[%c0_14, %c0_15] : memref<16x4xf32, #tpu.memory_space<vmem>>, vector<16x4xf32>
      %cst_16 = arith.constant dense<0.000000e+00> : vector<4xf32>
      %18 = vector.multi_reduction <add>, %17, %cst_16 [0] : vector<16x4xf32> to vector<4xf32>
      %19 = vector.shape_cast %18 : vector<4xf32> to vector<1x4xf32>
      %cst_17 = arith.constant 5.120000e+02 : f32
      %20 = vector.broadcast %cst_17 : f32 to vector<1x4xf32>
      %21 = arith.divf %19, %20 : vector<1x4xf32>
      %c0_18 = arith.constant 0 : index
      %c0_19 = arith.constant 0 : index
      %22 = vector.load %arg5[%c0_18, %c0_19] : memref<16x4xf32, #tpu.memory_space<vmem>>, vector<16x4xf32>
      %cst_20 = arith.constant dense<0.000000e+00> : vector<4xf32>
      %23 = vector.multi_reduction <add>, %22, %cst_20 [0] : vector<16x4xf32> to vector<4xf32>
      %24 = vector.shape_cast %23 : vector<4xf32> to vector<1x4xf32>
      %cst_21 = arith.constant 5.120000e+02 : f32
      %25 = vector.broadcast %cst_21 : f32 to vector<1x4xf32>
      %26 = arith.divf %24, %25 : vector<1x4xf32>
      %27 = arith.mulf %21, %21 : vector<1x4xf32>
      %28 = arith.subf %26, %27 : vector<1x4xf32>
      %c0_22 = arith.constant 0 : index
      %c0_23 = arith.constant 0 : index
      %29 = vector.load %arg2[%c0_22, %c0_23] : memref<1x4xf32, #tpu.memory_space<vmem>>, vector<1x4xf32>
      tpu.vector_store %arg2[%c0_22, %c0_23], %21 {strides = array<i32>} : memref<1x4xf32, #tpu.memory_space<vmem>>, vector<1x4xf32>,
      %cst_24 = arith.constant 1.000000e-03 : f32
      %30 = vector.broadcast %cst_24 : f32 to vector<1x4xf32>
      %31 = arith.addf %28, %30 : vector<1x4xf32>
      %32 = math.rsqrt %31 : vector<1x4xf32>
      %c0_25 = arith.constant 0 : index
      %c0_26 = arith.constant 0 : index
      %33 = vector.load %arg3[%c0_25, %c0_26] : memref<1x4xf32, #tpu.memory_space<vmem>>, vector<1x4xf32>
      tpu.vector_store %arg3[%c0_25, %c0_26], %32 {strides = array<i32>} : memref<1x4xf32, #tpu.memory_space<vmem>>, vector<1x4xf32>,
    } else {
    }
    return
  }
  func.func @transform_0(%arg0: i32) -> (i32, i32, i32, i32) {
    %c0_i32 = arith.constant 0 : i32
    %c0_i32_0 = arith.constant 0 : i32
    %c0_i32_1 = arith.constant 0 : i32
    %c0_i32_2 = arith.constant 0 : i32
    return %arg0, %c0_i32, %c0_i32_0, %c0_i32_1 : i32, i32, i32, i32
  }
  func.func @transform_1(%arg0: i32) -> (i32, i32) {
    %c0_i32 = arith.constant 0 : i32
    %c0_i32_0 = arith.constant 0 : i32
    %c0_i32_1 = arith.constant 0 : i32
    return %c0_i32, %c0_i32_0 : i32, i32
  }
  func.func @transform_2(%arg0: i32) -> (i32, i32) {
    %c0_i32 = arith.constant 0 : i32
    %c0_i32_0 = arith.constant 0 : i32
    %c0_i32_1 = arith.constant 0 : i32
    return %c0_i32, %c0_i32_0 : i32, i32
  }
}

</mosaic_0001>

<bundles_post_ra>
// kernel: tpu_custom_call.1
= control target key start
LH: loop header
LB: loop body
LE: loop exit
PB: predicated region body
PF: predicated region fallthrough
CT: control target
= control target key end

     0   :  { %8 = vsyncpa [#allocation5], 0  ;;  %s855_s0 = inlined_call_operand.vmem [shape: f32[2,16,16,4], index: 0, kind: input, shape index: {}]   ;;  %s856_s1 = inlined_call_operand.hbm [shape: f32[1,4], index: 1, kind: output, shape index: {0}]   ;;  %s857_s2 = inlined_call_operand.hbm [shape: f32[1,4], index: 2, kind: output, shape index: {1}]  }
   0x1   :  { %9 = vsyncpa [#allocation7], 0  ;;  %s569_s9 = smov 0  }
   0x2 LB: > { %s575_s10 = sadd.s32 4294967295, %s549_s9   ;;  %p446_p0 = scmp.ge.s32.totalorder %s549_s9, 1  ;;  %s549_s9 = sphi %s569_s9, %s15_s9  }
   0x3   : > { %p107_p1 = scmp.lt.s32.totalorder %s549_s9, 3 }
   0x5   : > { %p108_p2 = pnand %p446_p0, %p107_p1 }
   0x6   : > { %p124_p3 = scmp.lt.s32.totalorder (!%p108_p2), %s575_s10, 1  ;;  %p449_p4 = scmp.ne.s32.totalorder (!%p108_p2), %s575_s10, 0 }
   0x7   : > { %111 = sbr.rel (%p108_p2) target bundleno = 170 (0xaa), region = 24 }
   0xe   : > { %s125_s11 = scalar_select %p124_p3, %s575_s10, 1 }
   0xf   : > { %132 = sbr.rel (%p449_p4) target bundleno = 22 (0x16), region = 28  ;;  %vm133_vm0 = vcmask (!%p449_p4), 31744   ;;  %v551_v0 = vmov (!%p449_p4), 0.0  }
  0x10   : > { %s457_s12 = sshll.u32 %s125_s11, 8  ;;  %134 = vst.msk [vmem:[#allocation2] sm:$0xff] (!%p449_p4), %vm133_vm0, %v551_v0  ;;  %135 = vst.msk [vmem:[#allocation2 + $0x8] sm:$0xff] (!%p449_p4), %vm133_vm0, %v551_v0 }
  0x11   : > { %s584_s15 = scalar_lea.vmem %s855_s0, %s457_s12  ;;  %136 = vst.msk [vmem:[#allocation3] sm:$0xff] (!%p449_p4), %vm133_vm0, %v551_v0  ;;  %137 = vst.msk [vmem:[#allocation3 + $0x8] sm:$0xff] (!%p449_p4), %vm133_vm0, %v551_v0 }
  0x16 PF: > { %v138_v1 = vld [vmem:[%s584_s15] sm:$0xff]  ;;  %v140_v2 = vld [vmem:[%s584_s15 + $0x10] sm:$0xff]  ;;  %vm172_vm1 = vcmask 31744   ;;  %v598_v13 = vld [vmem:[%s584_s15 + $0x8] sm:$0xff]  ;;  %p450_p5 = scmp.ne.s32.totalorder %s575_s10, 1 }
  0x17   : > { %v142_v3 = vld [vmem:[%s584_s15 + $0x20] sm:$0xff]  ;;  %v173_v4 = vsel %vm172_vm1, %v138_v1, 0.0  ;;  %v174_v5 = vsel %vm172_vm1, %v140_v2, 0.0  ;;  %v144_v7 = vld [vmem:[%s584_s15 + $0x30] sm:$0xff]  ;;  %v602_v16 = vld [vmem:[%s584_s15 + $0x18] sm:$0xff]  ;;  %v204_v18 = vsel %vm172_vm1, %v598_v13, 0.0  ;;  %v241_v34 = vmul.f32 %v138_v1, %v138_v1 }
  0x18   : > { %v176_v6 = vsel %vm172_vm1, %v142_v3, 0.0  ;;  %v175_v8 = vadd.f32 %v174_v5, %v173_v4  ;;  %v178_v9 = vsel %vm172_vm1, %v144_v7, 0.0  ;;  %v146_v10 = vld [vmem:[%s584_s15 + $0x40] sm:$0xff]  ;;  %v148_v14 = vld [vmem:[%s584_s15 + $0x50] sm:$0xff]  ;;  %v605_v17 = vld [vmem:[%s584_s15 + $0x28] sm:$0xff]  ;;  %v205_v20 = vsel %vm172_vm1, %v602_v16, 0.0 }
  0x19   : > { %v180_v12 = vsel %vm172_vm1, %v146_v10, 0.0  ;;  %v182_v19 = vsel %vm172_vm1, %v148_v14, 0.0  ;;  %v207_v21 = vsel %vm172_vm1, %v605_v17, 0.0  ;;  %v150_v22 = vld [vmem:[%s584_s15 + $0x60] sm:$0xff]  ;;  %v616_v24 = vld [vmem:[%s584_s15 + $0x38] sm:$0xff]  ;;  %v206_v25 = vadd.f32 %v205_v20, %v204_v18  ;;  %v622_v28 = vld [vmem:[%s584_s15 + $0x70] sm:$0xff] }
  0x1a   : > { %v177_v11 = vadd.f32 %v176_v6, %v175_v8  ;;  %v184_v26 = vsel %vm172_vm1, %v150_v22, 0.0  ;;  %v209_v27 = vsel %vm172_vm1, %v616_v24, 0.0  ;;  %v625_v30 = vld [vmem:[%s584_s15 + $0x48] sm:$0xff]  ;;  %v186_v32 = vsel %vm172_vm1, %v622_v28, 0.0  ;;  %v154_v35 = vld [vmem:[%s584_s15 + $0x80] sm:$0xff]  ;;  %v633_v36 = vld [vmem:[%s584_s15 + $0x90] sm:$0xff] }
  0x1b   : > { %v208_v31 = vadd.f32 %v207_v21, %v206_v25  ;;  %v211_v33 = vsel %vm172_vm1, %v625_v30, 0.0  ;;  %v636_v38 = vld [vmem:[%s584_s15 + $0x58] sm:$0xff]  ;;  %v243_v40 = vmul.f32 %v140_v2, %v140_v2  ;;  %v245_v41 = vmul.f32 %v142_v3, %v142_v3  ;;  %v639_v42 = vld [vmem:[%s584_s15 + $0xa0] sm:$0xff]  ;;  %v647_v46 = vld [vmem:[%s584_s15 + $0xb0] sm:$0xff] }
  0x1c   : > { %v179_v15 = vadd.f32 %v178_v9, %v177_v11  ;;  %v188_v43 = vsel %vm172_vm1, %v154_v35, 0.0  ;;  %v190_v44 = vsel %vm172_vm1, %v633_v36, 0.0  ;;  %v213_v45 = vsel %vm172_vm1, %v636_v38, 0.0  ;;  %v652_v49 = vld [vmem:[%s584_s15 + $0x68] sm:$0xff]  ;;  %v660_v56 = vld [vmem:[%s584_s15 + $0xc0] sm:$0xff]  ;;  %v663_v57 = vld [vmem:[%s584_s15 + $0xd0] sm:$0xff] }
  0x1d   : > { %v210_v39 = vadd.f32 %v209_v27, %v208_v31  ;;  %v192_v48 = vsel %vm172_vm1, %v639_v42, 0.0  ;;  %v247_v51 = vmul.f32 %v144_v7, %v144_v7  ;;  %v194_v52 = vsel %vm172_vm1, %v647_v46, 0.0  ;;  %v666_v59 = vld [vmem:[%s584_s15 + $0x78] sm:$0xff]  ;;  %v677_v3 = vld [vmem:[%s584_s15 + $0xe0] sm:$0xff]  ;;  %v680_v4 = vld [vmem:[%s584_s15 + $0xf0] sm:$0xff] }
  0x1e   : > { %v181_v23 = vadd.f32 %v180_v12, %v179_v15  ;;  %v215_v53 = vsel %vm172_vm1, %v652_v49, 0.0  ;;  %v249_v54 = vmul.f32 %v146_v10, %v146_v10  ;;  %v273_v55 = vsel %vm172_vm1, %v241_v34, 0.0  ;;  %v683_v6 = vld [vmem:[%s584_s15 + $0x88] sm:$0xff]  ;;  %v712_v34 = vld [vmem:[%s584_s15 + $0xd8] sm:$0xff] }
  0x1f   : > { %v212_v50 = vadd.f32 %v211_v33, %v210_v39  ;;  %v274_v61 = vsel %vm172_vm1, %v243_v40, 0.0  ;;  %v276_v62 = vsel %vm172_vm1, %v245_v41, 0.0  ;;  %v196_v63 = vsel %vm172_vm1, %v660_v56, 0.0  ;;  %v696_v20 = vld [vmem:[%s584_s15 + $0xa8] sm:$0xff] }
  0x20   : > { %v183_v29 = vadd.f32 %v182_v19, %v181_v23  ;;  %v198_v0 = vsel %vm172_vm1, %v663_v57, 0.0  ;;  %v217_v1 = vsel %vm172_vm1, %v666_v59, 0.0  ;;  %v275_v2 = vadd.f32 %v274_v61, %v273_v55  ;;  %v693_v19 = vld [vmem:[%s584_s15 + $0x98] sm:$0xff]  ;;  %v709_v33 = vld [vmem:[%s584_s15 + $0xc8] sm:$0xff] }
  0x21   : > { %v214_v60 = vadd.f32 %v213_v45, %v212_v50  ;;  %v251_v8 = vmul.f32 %v148_v14, %v148_v14  ;;  %v278_v9 = vsel %vm172_vm1, %v247_v51, 0.0  ;;  %v200_v10 = vsel %vm172_vm1, %v677_v3, 0.0  ;;  %v699_v14 = vld [vmem:[%s584_s15 + $0xb8] sm:$0xff] }
  0x22   : > { %v185_v37 = vadd.f32 %v184_v26, %v183_v29  ;;  %v202_v11 = vsel %vm172_vm1, %v680_v4, 0.0  ;;  %v219_v12 = vsel %vm172_vm1, %v683_v6, 0.0  ;;  %v277_v15 = vadd.f32 %v276_v62, %v275_v2 }
  0x23   : > { %v216_v7 = vadd.f32 %v215_v53, %v214_v60  ;;  %v253_v23 = vmul.f32 %v150_v22, %v150_v22  ;;  %v280_v25 = vsel %vm172_vm1, %v249_v54, 0.0  ;;  %v221_v26 = vsel %vm172_vm1, %v693_v19, 0.0 }
  0x24   : > { %v187_v47 = vadd.f32 %v186_v32, %v185_v37  ;;  %v223_v27 = vsel %vm172_vm1, %v696_v20, 0.0  ;;  %v225_v29 = vsel %vm172_vm1, %v699_v14, 0.0  ;;  %v279_v31 = vadd.f32 %v278_v9, %v277_v15 }
  0x25   : > { %v218_v21 = vadd.f32 %v217_v1, %v216_v7  ;;  %v255_v22 = vmul.f32 %v622_v28, %v622_v28  ;;  %v282_v39 = vsel %vm172_vm1, %v251_v8, 0.0  ;;  %v227_v40 = vsel %vm172_vm1, %v709_v33, 0.0 }
  0x26   : > { %v189_v58 = vadd.f32 %v188_v43, %v187_v47  ;;  %v229_v41 = vsel %vm172_vm1, %v712_v34, 0.0  ;;  %v257_v43 = vmul.f32 %v154_v35, %v154_v35  ;;  %v722_v47 = vld [vmem:[%s584_s15 + $0xe8] sm:$0xff]  ;;  %v284_v50 = vsel %vm172_vm1, %v253_v23, 0.0 }
  0x27   : > { %v220_v37 = vadd.f32 %v219_v12, %v218_v21  ;;  %v242_v51 = vmul.f32 %v598_v13, %v598_v13  ;;  %v231_v28 = vsel %vm172_vm1, %v722_v47, 0.0  ;;  %v244_v53 = vmul.f32 %v602_v16, %v602_v16 }
  0x28   : > { %v191_v5 = vadd.f32 %v190_v44, %v189_v58  ;;  %v281_v44 = vadd.f32 %v280_v25, %v279_v31  ;;  %v246_v35 = vmul.f32 %v605_v17, %v605_v17  ;;  %v259_v58 = vmul.f32 %v633_v36, %v633_v36  ;;  %v170_v36 = vld [vmem:[#allocation2] sm:$0xff] }
  0x29   : > { %v286_v60 = vsel %vm172_vm1, %v255_v22, 0.0  ;;  %v261_v13 = vmul.f32 %v639_v42, %v639_v42  ;;  %v263_v61 = vmul.f32 %v647_v46, %v647_v46  ;;  %v248_v16 = vmul.f32 %v616_v24, %v616_v24  ;;  %v171_v22 = vld [vmem:[#allocation2 + $0x8] sm:$0xff] }
  0x2a   : > { %v193_v18 = vadd.f32 %v192_v48, %v191_v5  ;;  %v222_v48 = vadd.f32 %v221_v26, %v220_v37  ;;  %v288_v17 = vsel %vm172_vm1, %v257_v43, 0.0  ;;  %v250_v5 = vmul.f32 %v625_v30, %v625_v30  ;;  %v169_v30 = vld [vmem:[%s584_s15 + $0xf8] sm:$0xff] }
  0x2b   : > { %v305_v42 = vsel %vm172_vm1, %v244_v53, 0.0  ;;  %v307_v46 = vsel %vm172_vm1, %v246_v35, 0.0  ;;  %v290_v24 = vsel %vm172_vm1, %v259_v58, 0.0  ;;  %v252_v15 = vmul.f32 %v636_v38, %v636_v38 }
  0x2c   : > { %v195_v32 = vadd.f32 %v194_v52, %v193_v18  ;;  %v283_v52 = vadd.f32 %v282_v39, %v281_v44  ;;  %v224_v55 = vadd.f32 %v223_v27, %v222_v48  ;;  %v309_v18 = vsel %vm172_vm1, %v248_v16, 0.0  ;;  %v239_v16 = vld [vmem:[#allocation3] sm:$0xff] }
  0x2d   : > { %v292_v25 = vsel %vm172_vm1, %v261_v13, 0.0  ;;  %v267_v38 = vmul.f32 %v663_v57, %v663_v57  ;;  %v258_v57 = vmul.f32 %v683_v6, %v683_v6  ;;  %v262_v58 = vmul.f32 %v696_v20, %v696_v20 }
  0x2e   : > { %v197_v45 = vadd.f32 %v196_v63, %v195_v32  ;;  %v285_v62 = vadd.f32 %v284_v50, %v283_v52  ;;  %v226_v1 = vadd.f32 %v225_v29, %v224_v55  ;;  %v254_v29 = vmul.f32 %v652_v49, %v652_v49 }
  0x2f   : > { %v294_v32 = vsel %vm172_vm1, %v263_v61, 0.0  ;;  %v269_v49 = vmul.f32 %v677_v3, %v677_v3  ;;  %v260_v3 = vmul.f32 %v693_v19, %v693_v19  ;;  %v264_v19 = vmul.f32 %v699_v14, %v699_v14 }
  0x30   : > { %v199_v54 = vadd.f32 %v198_v0, %v197_v45  ;;  %v304_v0 = vsel %vm172_vm1, %v242_v51, 0.0  ;;  %v287_v2 = vadd.f32 %v286_v60, %v285_v62  ;;  %v228_v8 = vadd.f32 %v227_v40, %v226_v1 }
  0x31   : > { %v306_v9 = vadd.f32 %v305_v42, %v304_v0  ;;  %v256_v40 = vmul.f32 %v666_v59, %v666_v59  ;;  %v315_v50 = vsel %vm172_vm1, %v254_v29, 0.0  ;;  %v298_v59 = vsel %vm172_vm1, %v267_v38, 0.0 }
  0x32   : > { %v201_v63 = vadd.f32 %v200_v10, %v199_v54  ;;  %v265_v10 = vmul.f32 %v660_v56, %v660_v56  ;;  %v289_v12 = vadd.f32 %v288_v17, %v287_v2  ;;  %v230_v23 = vadd.f32 %v229_v41, %v228_v8 }
  0x33   : > { %v308_v26 = vadd.f32 %v307_v46, %v306_v9  ;;  %v311_v56 = vsel %vm172_vm1, %v250_v5, 0.0  ;;  %v313_v41 = vsel %vm172_vm1, %v252_v15, 0.0  ;;  %v317_v35 = vsel %vm172_vm1, %v256_v40, 0.0  ;;  %v240_v15 = vld [vmem:[#allocation3 + $0x8] sm:$0xff] }
  0x34   : > { %v203_v7 = vadd.f32 %v202_v11, %v201_v63  ;;  %v233_v11 = vsel %vm172_vm1, %v169_v30, 0.0  ;;  %v291_v27 = vadd.f32 %v290_v24, %v289_v12  ;;  %v232_v31 = vadd.f32 %v231_v28, %v230_v23 }
  0x35   : > { %v310_v37 = vadd.f32 %v309_v18, %v308_v26  ;;  %v296_v44 = vsel %vm172_vm1, %v265_v10, 0.0  ;;  %v271_v28 = vmul.f32 %v680_v4, %v680_v4  ;;  %v300_v54 = vsel %vm172_vm1, %v269_v49, 0.0 }
  0x36   : > { %v235_v21 = vadd.f32 %v203_v7, %v170_v36  ;;  %v293_v39 = vadd.f32 %v292_v25, %v291_v27  ;;  %v234_v43 = vadd.f32 %v233_v11, %v232_v31  ;;  %v319_v4 = vsel %vm172_vm1, %v258_v57, 0.0 }
  0x37   : > { %v312_v45 = vadd.f32 %v311_v56, %v310_v37  ;;  %v302_v60 = vsel %vm172_vm1, %v271_v28, 0.0  ;;  %v321_v62 = vsel %vm172_vm1, %v260_v3, 0.0  ;;  %v266_v17 = vmul.f32 %v709_v33, %v709_v33 }
  0x38   : > { %237 = vst.msk [vmem:[#allocation2] sm:$0xff] %vm172_vm1, %v235_v21  ;;  %v295_v48 = vadd.f32 %v294_v32, %v293_v39  ;;  %v236_v51 = vadd.f32 %v234_v43, %v171_v22  ;;  %v323_v0 = vsel %vm172_vm1, %v262_v58, 0.0  ;;  %v268_v2 = vmul.f32 %v712_v34, %v712_v34 }
  0x39   : > { %v314_v52 = vadd.f32 %v313_v41, %v312_v45  ;;  %v325_v5 = vsel %vm172_vm1, %v264_v19, 0.0  ;;  %v270_v14 = vmul.f32 %v722_v47, %v722_v47  ;;  %v327_v46 = vsel %vm172_vm1, %v266_v17, 0.0 }
  0x3a   : > { %v297_v53 = vadd.f32 %v296_v44, %v295_v48  ;;  %238 = vst.msk [vmem:[#allocation2 + $0x8] sm:$0xff] %vm172_vm1, %v236_v51  ;;  %v272_v8 = vmul.f32 %v169_v30, %v169_v30  ;;  %v329_v33 = vsel %vm172_vm1, %v268_v2, 0.0  ;;  %vm370_vm2 = vcmask (!%p450_p5), 24576  }
  0x3b   : > { %v316_v6 = vadd.f32 %v315_v50, %v314_v52  ;;  %v331_v9 = vsel %vm172_vm1, %v270_v14, 0.0 }
  0x3c   : > { %v299_v55 = vadd.f32 %v298_v59, %v297_v53  ;;  %v333_v34 = vsel %vm172_vm1, %v272_v8, 0.0 }
  0x3d   : > { %v318_v13 = vadd.f32 %v317_v35, %v316_v6 }
  0x3e   : > { %v301_v61 = vadd.f32 %v300_v54, %v299_v55 }
  0x3f   : > { %v320_v63 = vadd.f32 %v319_v4, %v318_v13  ;;  %v343_v47 = vld [vmem:[#allocation2] sm:$0xff] (!%p450_p5) }
  0x40   : > { %v303_v1 = vadd.f32 %v302_v60, %v301_v61  ;;  %v345_v25 = vsel (!%p450_p5), %vm172_vm1, %v343_v47, 0.0 }
  0x41   : > { %v322_v20 = vadd.f32 %v321_v62, %v320_v63  ;;  %v344_v23 = vld [vmem:[#allocation2 + $0x8] sm:$0xff] (!%p450_p5) }
  0x42   : > { %v335_v36 = vadd.f32 %v303_v1, %v239_v16  ;;  %v346_v26 = vsel (!%p450_p5), %vm172_vm1, %v344_v23, 0.0 }
  0x43   : > { %v324_v42 = vadd.f32 %v323_v0, %v322_v20  ;;  %v347_v29 = vadd.f32 (!%p450_p5), %v346_v26, %v345_v25 }
  0x44   : > { %337 = vst.msk [vmem:[#allocation3] sm:$0xff] %vm172_vm1, %v335_v36 }
  0x45   : > { %v326_v7 = vadd.f32 %v325_v5, %v324_v42  ;;  %v348_v38 = vrot.slane (!%p450_p5), %v347_v29, 4 }
  0x47   : > { %v328_v24 = vadd.f32 %v327_v46, %v326_v7  ;;  %v349_v37 = vadd.f32 (!%p450_p5), %v348_v38, %v347_v29 }
  0x49   : > { %v330_v10 = vadd.f32 %v329_v33, %v328_v24  ;;  %v350_v39 = vrot.slane (!%p450_p5), %v349_v37, 2 }
  0x4b   : > { %v332_v12 = vadd.f32 %v331_v9, %v330_v10  ;;  %342 = sbr.rel (%p450_p5) target bundleno = 122 (0x7a), region = 32  ;;  %v356_v30 = vld [vmem:[#allocation3] sm:$0xff] (!%p450_p5)  ;;  %v351_v41 = vadd.f32 (!%p450_p5), %v350_v39, %v349_v37 }
  0x4c   : > { %v358_v27 = vsel (!%p450_p5), %vm172_vm1, %v356_v30, 0.0 }
  0x4d   : > { %v334_v18 = vadd.f32 %v333_v34, %v332_v12  ;;  %v352_v49 = vrot.slane (!%p450_p5), %v351_v41, 1 }
  0x4f   : > { %v336_v21 = vadd.f32 %v334_v18, %v240_v15  ;;  %v353_v45 = vadd.f32 (!%p450_p5), %v352_v49, %v351_v41 }
  0x51   : > { %338 = vst.msk [vmem:[#allocation3 + $0x8] sm:$0xff] %vm172_vm1, %v336_v21  ;;  %v355_v57 = vmul.f32 (!%p450_p5), 0.001953125, %v353_v45 }
  0x53   : > { %v368_v51 = vmul.f32 %v355_v57, %v355_v57  ;;  %371 = vst.msk [vmem:[#allocation4] sm:$0x1] %vm370_vm2, %v355_v57 }
  0x58   : > { %v357_v11 = vld [vmem:[#allocation3 + $0x8] sm:$0xff] }
  0x59   : > { %v359_v56 = vsel %vm172_vm1, %v357_v11, 0.0 }
  0x5a   : > { %v360_v31 = vadd.f32 %v359_v56, %v358_v27 }
  0x5c   : > { %v361_v32 = vrot.slane %v360_v31, 4 }
  0x5e   : > { %v362_v22 = vadd.f32 %v361_v32, %v360_v31 }
  0x60   : > { %v363_v40 = vrot.slane %v362_v22, 2 }
  0x62   : > { %v364_v43 = vadd.f32 %v363_v40, %v362_v22 }
  0x64   : > { %v365_v44 = vrot.slane %v364_v43, 1 }
  0x66   : > { %v366_v48 = vadd.f32 %v365_v44, %v364_v43 }
  0x68   : > { %v367_v50 = vmul.f32 0.001953125, %v366_v48 }
  0x6a   : > { %v369_v28 = vsub.f32 %v367_v50, %v368_v51 }
  0x6c   : > { %v372_v59 = vadd.f32 0.001, %v369_v28 }
  0x6e   : > { %481 = vrsqrt.f32 %v372_v59 }
  0x78   : > { %v482_v52 = vpop.eup %481 }
  0x79   : > { %374 = vst.msk [vmem:[#allocation6] sm:$0x1] %vm370_vm2, %v482_v52 }
  0x7a PF: > { %p466_p6 = scmp.eq.s32.totalorder %s575_s10, 1  ;;  %s552_s16 = smov [#allocation4]  }
  0x7b   : > { %s382_s17 = sshll.u32 %s552_s16, 4  ;;  %s553_s18 = smov [#allocation6]   ;;  %s383_s17 = int_to_ptr.vmem [resolvable:$true] %s382_s17 }
  0x7c   : > { %s393_s19 = sshll.u32 %s553_s18, 4  ;;  %s483_s20 = scalar_lea.vmem %s383_s17, 16  ;;  %s394_s19 = int_to_ptr.vmem [resolvable:$true] %s393_s19 }
  0x7d   : > { %p484_p7 = scmp.ne.s32.totalorder %s383_s17, %s483_s20  ;;  %s489_s21 = scalar_lea.vmem %s383_s17, 32 }
  0x7e   : > { %p490_p10 = scmp.lt.s32.totalorder %s383_s17, %s383_s17  ;;  %p491_p11 = scmp.lt.s32.totalorder %s489_s21, %s483_s20 }
  0x7f   : > { %p485_p8 = pnand %p484_p7, %p466_p6 }
  0x80   : > { %p492_p12 = por %p491_p11, %p490_p10 }
  0x81   : > { %p486_p9 = pneg %p485_p8 }
  0x83   : > { %p493_p13 = pnand %p492_p12, %p486_p9 }
  0x85   : > { %496 = shalt.err (!%p493_p13)
}
  0x86   : > { %s497_s24 = scalar_lea.hbm %s856_s1, 16 }
  0x87   : > { %p498_p0 = scmp.ne.s32.totalorder %s856_s1, %s497_s24  ;;  %p503_p3 = scmp.lt.u32.totalorder %s497_s24, %s856_s1 }
  0x89   : > { %p499_p1 = pnand %p498_p0, %p466_p6 }
  0x8b   : > { %p500_p2 = pneg %p499_p1 }
  0x8d   : > { %p505_p4 = pnand %p503_p3, %p500_p2 }
  0x8f   : > { %508 = shalt.err (!%p505_p4)
}
  0x90   : > { %459 = dma.vmem_to_hbm [thread:$0]  (%p466_p6), %s383_s17, 16, %s856_s1, [#allocation5]  }
  0x91   : > { %s509_s3 = scalar_lea.vmem %s394_s19, 16  ;;  %s515_s4 = scalar_lea.vmem %s394_s19, 32 }
  0x92   : > { %p510_p5 = scmp.ne.s32.totalorder %s394_s19, %s509_s3  ;;  %p516_p9 = scmp.lt.s32.totalorder %s394_s19, %s394_s19 }
  0x93   : > { %p517_p10 = scmp.lt.s32.totalorder %s515_s4, %s509_s3 }
  0x94   : > { %p511_p7 = pnand %p510_p5, %p466_p6 }
  0x95   : > { %p518_p11 = por %p517_p10, %p516_p9 }
  0x96   : > { %p512_p8 = pneg %p511_p7 }
  0x98   : > { %p519_p12 = pnand %p518_p11, %p512_p8 }
  0x9a   : > { %522 = shalt.err (!%p519_p12)
}
  0x9b   : > { %s523_s7 = scalar_lea.hbm %s857_s2, 16 }
  0x9c   : > { %p524_p13 = scmp.ne.s32.totalorder %s857_s2, %s523_s7  ;;  %p529_p2 = scmp.lt.u32.totalorder %s523_s7, %s857_s2 }
  0x9e   : > { %p525_p0 = pnand %p524_p13, %p466_p6 }
  0xa0   : > { %p526_p1 = pneg %p525_p0 }
  0xa2   : > { %p531_p3 = pnand %p529_p2, %p526_p1 }
  0xa4   : > { %534 = shalt.err (!%p531_p3)
}
  0xa5   : > { %461 = dma.vmem_to_hbm [thread:$0]  (%p466_p6), %s394_s19, 16, %s857_s2, [#allocation7]  }
  0xa6   : > { %540 = dma.done.wait (%p466_p6), [#allocation5], 16  }
  0xa7   : > { %542 = vsyncadd (%p466_p6), [#allocation5], 4294967280 }
  0xa8   : > { %544 = dma.done.wait (%p466_p6), [#allocation7], 16  }
  0xa9   : > { %546 = vsyncadd (%p466_p6), [#allocation7], 4294967280 }
  0xaa PF: > { %s15_s9 = sadd.s32 1, %s549_s9  }
  0xab   : > { %p12_p4 = scmp.ge.s32.totalorder %s15_s9, 4  }
  0xad   :  { %14 = sbr.rel (!%p12_p4) target bundleno = 2 (0x2), region = 67 }
  0xb4   :  { %410 = vsyncpa [#allocation5], 1 }
  0xb5   :  { %412 = vsyncpa [#allocation5 + $0x1], 1 }
  0xb6   :  { %413 = vsyncpa [#allocation7], 1 }

</bundles_post_ra>
